<compile_context>
chip_gen: v5e
topology: v5e:2x2
jax: 0.10.0
libtpu: 0.0.40
codegen_flags: <defaults>
</compile_context>

<pallas_src>
import jax
import jax.numpy as jnp
from jax import lax
from jax.experimental import pallas as pl
from jax.experimental.pallas import tpu as pltpu


def _round_up(n, m):
    return ((n + m - 1) // m) * m


def mlp_kernel(x_ref, w1_ref, b1_ref, w2_ref, b2_ref, o_ref):
    # x_ref: (TB, 10)   w1_ref: (50, 10)   b1_ref: (50, 1)
    # w2_ref: (1, 50)   b2_ref: (1,) in SMEM   o_ref: (1, TB)
    #
    # fc1, computed with batch on the lane axis:
    #   h[f, b] = sum_k W1[f, k] * x[b, k]   (== (x @ W1^T)^T)
    # The transposed-RHS contraction lets the MXU consume x in its stored layout.
    h = lax.dot_general(
        w1_ref[...], x_ref[...],
        dimension_numbers=(((1,), (1,)), ((), ())),
        preferred_element_type=jnp.float32,
    )                                                   # (50, TB)
    h = jnp.maximum(h + b1_ref[...], 0.0)               # bias broadcasts over lanes
    # fc2: (1, 50) @ (50, TB) -> (1, TB)  -- already lane-dense.
    out = jnp.dot(w2_ref[...], h, preferred_element_type=jnp.float32)
    o_ref[...] = (out + b2_ref[0]).astype(o_ref.dtype)


def simple_model_forward(x, w1, b1, w2, b2, *, block_b=2048):
    """Computes relu(x @ w1.T + b1) @ w2.T + b2 -> (B, 1).

    x: (B, 10); w1: (50, 10); b1: (50,); w2: (1, 50); b2: (1,)  (PyTorch layouts).
    """
    B, f_in = x.shape
    hidden = w1.shape[0]

    # Batch tile: large, multiple of 8 (f32 sublanes); tiny batches become a single
    # full-extent block.  When the grid has >1 step, TB is a multiple of 128 so the
    # (1, TB) output blocks are lane-aligned.
    tb = min(block_b, _round_up(B, 8))
    bp = _round_up(B, tb)
    if bp != B:
        x = jnp.pad(x, ((0, bp - B), (0, 0)))

    b1_col = b1.reshape(hidden, 1)   # column bias -> broadcasts across the batch lanes
    b2_s = b2.reshape(1)             # scalar bias -> SMEM

    out_row = pl.pallas_call(
        mlp_kernel,
        out_shape=jax.ShapeDtypeStruct((1, bp), jnp.float32),
        grid=(bp // tb,),
        in_specs=[
            # x: tiled over batch, double-buffered HBM->VMEM by the Pallas pipeline.
            pl.BlockSpec((tb, f_in), lambda i: (i, 0),
                         memory_space=pltpu.MemorySpace.VMEM),
            # Weights / fc1 bias: constant block index -> fetched once, VMEM-resident.
            pl.BlockSpec((hidden, f_in), lambda i: (0, 0),
                         memory_space=pltpu.MemorySpace.VMEM),
            pl.BlockSpec((hidden, 1), lambda i: (0, 0),
                         memory_space=pltpu.MemorySpace.VMEM),
            pl.BlockSpec((1, hidden), lambda i: (0, 0),
                         memory_space=pltpu.MemorySpace.VMEM),
            # fc2 scalar bias: whole (1,) array in SMEM.
            pl.BlockSpec(memory_space=pltpu.MemorySpace.SMEM),
        ],
        out_specs=pl.BlockSpec((1, tb), lambda i: (0, i),
                               memory_space=pltpu.MemorySpace.VMEM),
        compiler_params=pltpu.CompilerParams(
            dimension_semantics=("parallel",),   # batch tiles shard across TCs on v7x
        ),
    )(x, w1, b1_col, w2, b2_s)

    # Lane-dense (1, Bp) row -> (B, 1) column; drop batch padding.
    return out_row.reshape(bp, 1)[:B]


def init_params(key):
    # Mimics nn.Linear's uniform(-1/sqrt(fan_in), 1/sqrt(fan_in)) init, PyTorch layouts.
    k1, k2, k3, k4 = jax.random.split(key, 4)
    bound1 = 1.0 / jnp.sqrt(10.0)
    bound2 = 1.0 / jnp.sqrt(50.0)
    w1 = jax.random.uniform(k1, (50, 10), jnp.float32, -bound1, bound1)  # fc1.weight
    b1 = jax.random.uniform(k2, (50,), jnp.float32, -bound1, bound1)     # fc1.bias
    w2 = jax.random.uniform(k3, (1, 50), jnp.float32, -bound2, bound2)   # fc2.weight
    b2 = jax.random.uniform(k4, (1,), jnp.float32, -bound2, bound2)      # fc2.bias
    return w1, b1, w2, b2


def _reference(x, w1, b1, w2, b2):
    h = jnp.maximum(x @ w1.T + b1[None, :], 0.0)
    return h @ w2.T + b2[None, :]


if __name__ == "__main__":
    key = jax.random.PRNGKey(0)
    kx, kx2, kp = jax.random.split(key, 3)
    w1, b1, w2, b2 = init_params(kp)

    # Small case consistent with the module spec (single-block path).
    B = 8
    x = jax.random.normal(kx, (B, 10), jnp.float32)
    out = jax.block_until_ready(simple_model_forward(x, w1, b1, w2, b2))
    assert out.shape == (B, 1)
    assert jnp.allclose(out, _reference(x, w1, b1, w2, b2), atol=1e-4, rtol=1e-4)

    # Larger batch exercising the tiled multi-step grid path (padding + 2 grid steps).
    B2 = 2500
    x2 = jax.random.normal(kx2, (B2, 10), jnp.float32)
    out2 = jax.block_until_ready(simple_model_forward(x2, w1, b1, w2, b2))
    assert out2.shape == (B2, 1)
    assert jnp.allclose(out2, _reference(x2, w1, b1, w2, b2), atol=1e-4, rtol=1e-4)

    print("KERNEL_OK")
</pallas_src>

<mosaic_0001>
module attributes {stable_mosaic.version = 11 : i64} {
  func.func @mlp_kernel(%arg0: i32, %arg1: memref<8x10xf32, #tpu.memory_space<vmem>>, %arg2: memref<50x10xf32, #tpu.memory_space<vmem>>, %arg3: memref<50x1xf32, #tpu.memory_space<vmem>>, %arg4: memref<1x50xf32, #tpu.memory_space<vmem>>, %arg5: memref<1xf32, #tpu.memory_space<smem>>, %arg6: memref<1x8xf32, #tpu.memory_space<vmem>>) attributes {dimension_semantics = [#tpu.dimension_semantics<parallel>], iteration_bounds = array<i64: 1>, scalar_prefetch = 0 : i64, scratch_operands = 0 : i64, tpu.core_type = #tpu.core_type<tc>, window_params = [{transform_indices = @transform_0, window_bounds = array<i64: 8, 10>}, {pipeline_mode = #tpu.pipeline_mode<synchronous>, transform_indices = @transform_1, window_bounds = array<i64: 50, 10>}, {pipeline_mode = #tpu.pipeline_mode<synchronous>, transform_indices = @transform_2, window_bounds = array<i64: 50, 1>}, {pipeline_mode = #tpu.pipeline_mode<synchronous>, transform_indices = @transform_3, window_bounds = array<i64: 1, 50>}, {transform_indices = @transform_4, window_bounds = array<i64: 1>}, {transform_indices = @transform_5, window_bounds = array<i64: 1, 8>}]} {
    %c0 = arith.constant 0 : index
    %c0_0 = arith.constant 0 : index
    %0 = vector.load %arg2[%c0, %c0_0] : memref<50x10xf32, #tpu.memory_space<vmem>>, vector<50x10xf32>
    %c0_1 = arith.constant 0 : index
    %c0_2 = arith.constant 0 : index
    %1 = vector.load %arg1[%c0_1, %c0_2] : memref<8x10xf32, #tpu.memory_space<vmem>>, vector<8x10xf32>
    %cst = arith.constant dense<0.000000e+00> : vector<50x8xf32>
    %2 = tpu.matmul %0, %1, %cst {dimension_numbers = #tpu.dot_dimension_numbers<[1], [1], [0], [0], [0, 0, 1, 0], [], []>} : vector<50x10xf32>, vector<8x10xf32>, vector<50x8xf32> -> vector<50x8xf32>
    %c0_3 = arith.constant 0 : index
    %c0_4 = arith.constant 0 : index
    %3 = vector.load %arg3[%c0_3, %c0_4] : memref<50x1xf32, #tpu.memory_space<vmem>>, vector<50x1xf32>
    %4 = vector.broadcast %3 : vector<50x1xf32> to vector<50x8xf32>
    %5 = arith.addf %2, %4 : vector<50x8xf32>
    %cst_5 = arith.constant 0.000000e+00 : f32
    %6 = vector.broadcast %cst_5 : f32 to vector<50x8xf32>
    %7 = arith.maximumf %5, %6 : vector<50x8xf32>
    %c0_6 = arith.constant 0 : index
    %c0_7 = arith.constant 0 : index
    %8 = vector.load %arg4[%c0_6, %c0_7] : memref<1x50xf32, #tpu.memory_space<vmem>>, vector<1x50xf32>
    %cst_8 = arith.constant dense<0.000000e+00> : vector<1x8xf32>
    %9 = tpu.matmul %8, %7, %cst_8 {dimension_numbers = #tpu.dot_dimension_numbers<[1], [0], [0], [1], [0, 0, 1, 1], [], []>} : vector<1x50xf32>, vector<50x8xf32>, vector<1x8xf32> -> vector<1x8xf32>
    %c0_9 = arith.constant 0 : index
    %10 = memref.load %arg5[%c0_9] : memref<1xf32, #tpu.memory_space<smem>>
    %11 = vector.broadcast %10 : f32 to vector<1x8xf32>
    %12 = arith.addf %9, %11 : vector<1x8xf32>
    %c0_10 = arith.constant 0 : index
    %c0_11 = arith.constant 0 : index
    %13 = vector.load %arg6[%c0_10, %c0_11] : memref<1x8xf32, #tpu.memory_space<vmem>>, vector<1x8xf32>
    tpu.vector_store %arg6[%c0_10, %c0_11], %12 {strides = array<i32>} : memref<1x8xf32, #tpu.memory_space<vmem>>, vector<1x8xf32>,
    return
  }
  func.func @transform_0(%arg0: i32) -> (i32, i32) {
    %c0_i32 = arith.constant 0 : i32
    %c0_i32_0 = arith.constant 0 : i32
    return %arg0, %c0_i32 : i32, i32
  }
  func.func @transform_1(%arg0: i32) -> (i32, i32) {
    %c0_i32 = arith.constant 0 : i32
    %c0_i32_0 = arith.constant 0 : i32
    %c0_i32_1 = arith.constant 0 : i32
    return %c0_i32, %c0_i32_0 : i32, i32
  }
  func.func @transform_2(%arg0: i32) -> (i32, i32) {
    %c0_i32 = arith.constant 0 : i32
    %c0_i32_0 = arith.constant 0 : i32
    %c0_i32_1 = arith.constant 0 : i32
    return %c0_i32, %c0_i32_0 : i32, i32
  }
  func.func @transform_3(%arg0: i32) -> (i32, i32) {
    %c0_i32 = arith.constant 0 : i32
    %c0_i32_0 = arith.constant 0 : i32
    %c0_i32_1 = arith.constant 0 : i32
    return %c0_i32, %c0_i32_0 : i32, i32
  }
  func.func @transform_4(%arg0: i32) -> i32 {
    %c0_i32 = arith.constant 0 : i32
    %c0_i32_0 = arith.constant 0 : i32
    return %c0_i32 : i32
  }
  func.func @transform_5(%arg0: i32) -> (i32, i32) {
    %c0_i32 = arith.constant 0 : i32
    %c0_i32_0 = arith.constant 0 : i32
    return %c0_i32, %arg0 : i32, i32
  }
}

</mosaic_0001>

<bundles_post_ra>
// kernel: tpu_custom_call.1
= control target key start
LH: loop header
LB: loop body
LE: loop exit
PB: predicated region body
PF: predicated region fallthrough
CT: control target
= control target key end

     0   :  { %vm72_vm0 = vcmask 80896   ;;  %v234_v4 = vmov 0   ;;  %s330_s0 = inlined_call_operand.vmem [shape: f32[8,10], index: 0, kind: input, shape index: {}]   ;;  %s331_s1 = inlined_call_operand.vmem [shape: f32[50,10], index: 1, kind: input, shape index: {}]   ;;  %s332_s2 = inlined_call_operand.vmem [shape: f32[50,1], index: 2, kind: input, shape index: {}]   ;;  %s333_s3 = inlined_call_operand.vmem [shape: f32[1,50], index: 3, kind: input, shape index: {}]   ;;  %s334_s4 = inlined_call_operand.<no memory space> [shape: f32[1], index: 4, kind: input, shape index: {}]   ;;  %s335_s5 = inlined_call_operand.hbm [shape: f32[1,8], index: 5, kind: output, shape index: {}]  }
   0x1   :  { %v29_v0 = vld [vmem:[%s330_s0] sm:$0xff]  ;;  %v36_v3 = vld [vmem:[%s332_s2 + $0x30] sm:$0x3]  ;;  %205 = vset.pattern.permute.xlu0 %v234_v4  ;;  %v25_v5 = vld [vmem:[%s331_s1 + $0x18] sm:$0xff]  ;;  %206 = vset.pattern.permute.xlu1 %v234_v4 }
   0x2   :  { %202 = vmatpush.xpose.msk.msra.mxu3 %vm72_vm0, %v29_v0  ;;  %v26_v1 = vld [vmem:[%s331_s1 + $0x20] sm:$0xff]  ;;  %191 = vmatpush.xpose.msk.msra.mxu0 %vm72_vm0, %v29_v0  ;;  %v32_v7 = vld [vmem:[%s332_s2 + $0x10] sm:$0xff] }
   0x3   :  { %v22_v2 = vld [vmem:[%s331_s1] sm:$0xff]  ;;  %201 = vmatpush.xpose.msk.msra.mxu2 %vm72_vm0, %v29_v0  ;;  %69 = vperm.xlu0 %205, %v36_v3  }
   0x4   :  { %v34_v6 = vld [vmem:[%s332_s2 + $0x20] sm:$0xff] }
   0x5   :  { %196 = vmatmul.msk.f32.vlgmr.msra.gmra.mxu3 %vm72_vm0, %v26_v1  ;;  %192 = vmatmul.msk.f32.vlgmr.msra.gmra.mxu0 %vm72_vm0, %v22_v2 }
   0x6   :  { %195 = vmatmul.msk.f32.vlgmr.msra.gmra.mxu2 %vm72_vm0, %v25_v5  ;;  %59 = vperm.xlu1 %206, %v34_v6  }
   0x7   :  { %11 = vsyncpa [#allocation4], 0  ;;  %207 = vset.pattern.permute.xlu2 %v234_v4  ;;  %v35_v8 = vld [vmem:[%s332_s2 + $0x28] sm:$0xff]  ;;  %v33_v11 = vld [vmem:[%s332_s2 + $0x18] sm:$0xff]  ;;  %vm149_vm1 = vcmask 1041408   ;;  %vm145_vm2 = vcmask 408576   ;;  %v144_v45 = vstv %s334_s4 }
   0x8   :  { %49 = vperm.xlu2 %207, %v32_v7   ;;  %v27_v9 = vld [vmem:[%s331_s1 + $0x28] sm:$0xff]  ;;  %v30_v13 = vld [vmem:[%s332_s2] sm:$0xff]  ;;  %v28_v14 = vld [vmem:[%s331_s1 + $0x30] sm:$0x3]  ;;  %s235_s24 = smov [#allocation3]   ;;  %s182_s27 = sshll.u32 %s335_s5, 4  ;;  %s183_s27 = int_to_ptr.hbm [resolvable:$true] %s182_s27 }
   0x9   :  { %v23_v10 = vld [vmem:[%s331_s1 + $0x8] sm:$0xff]  ;;  %v24_v15 = vld [vmem:[%s331_s1 + $0x10] sm:$0xff]  ;;  %v142_v44 = vld [vmem:[%s333_s3] sm:$0x1]  ;;  %s180_s25 = sshll.u32 %s235_s24, 4  ;;  %vm173_vm3 = vcmask 57344   ;;  %s181_s25 = int_to_ptr.vmem [resolvable:$true] %s180_s25 }
   0xa   :  { %v31_v12 = vld [vmem:[%s332_s2 + $0x8] sm:$0xff] }
   0xb   :  { %64 = vperm.xlu0 %205, %v35_v8  }
   0xd   :  { %197 = vmatmul.msk.f32.gmra.mxu3 %vm72_vm0, %v27_v9  ;;  %193 = vmatmul.msk.f32.gmra.mxu0 %vm72_vm0, %v23_v10 }
   0xe   :  { %54 = vperm.xlu1 %206, %v33_v11  }
  0x10   :  { %44 = vperm.xlu2 %207, %v31_v12  }
  0x13   :  { %39 = vperm.xlu0 %205, %v30_v13  }
  0x15   :  { %198 = vmatmul.msk.f32.gmra.mxu3 %vm72_vm0, %v28_v14  ;;  %194 = vmatmul.msk.f32.gmra.mxu0 %vm72_vm0, %v24_v15 }
  0x62   :  { %v50_v22 = vpop.permute.xlu2 %49 }
  0x6a   :  { %v45_v34 = vpop.permute.xlu2 %44 }
  0x75   :  { %v70_v18 = vpop.permute.xlu0 %69 }
  0x78   :  { %v60_v20 = vpop.permute.xlu1 %59 }
  0x7d   :  { %v65_v23 = vpop.permute.xlu0 %64 }
  0x80   :  { %v55_v27 = vpop.permute.xlu1 %54 }
  0x82   :  { %v114_v17 = vpop.f32.mrf.mxu0 }
  0x85   :  { %v40_v37 = vpop.permute.xlu0 %39 }
  0x86   :  { %v115_v40 = vadd.f32 %v114_v17, %v40_v37 }
  0x88   :  { %v126_v16 = vpop.f32.mrf.mxu3  ;;  %v135_v43 = vmax.f32 %v115_v40, 0.0 }
  0x89   :  { %v123_v28 = vpop.f32.mrf.mxu2  ;;  %v127_v29 = vadd.f32 %v126_v16, %v60_v20 }
  0x8a   :  { %v117_v21 = vpop.f32.mrf.mxu0  ;;  %v124_v33 = vadd.f32 %v123_v28, %v55_v27 }
  0x8b   :  { %v139_v35 = vmax.f32 %v127_v29, 0.0  ;;  %v118_v39 = vadd.f32 %v117_v21, %v45_v34 }
  0x8c   :  { %v138_v38 = vmax.f32 %v124_v33, 0.0 }
  0x8d   :  { %v136_v42 = vmax.f32 %v118_v39, 0.0 }
  0x90   :  { %v129_v19 = vpop.f32.mrf.mxu3 }
  0x91   :  { %v130_v25 = vadd.f32 %v129_v19, %v65_v23 }
  0x92   :  { %v120_v31 = vpop.f32.mrf.mxu0 }
  0x93   :  { %v140_v32 = vmax.f32 %v130_v25, 0.0  ;;  %v121_v36 = vadd.f32 %v120_v31, %v50_v22 }
  0x95   :  { %v137_v41 = vmax.f32 %v121_v36, 0.0 }
  0x98   :  { %v132_v24 = vpop.f32.mrf.mxu3 }
  0x99   :  { %v133_v26 = vadd.f32 %v132_v24, %v70_v18 }
  0x9b   :  { %v141_v30 = vmax.f32 %v133_v26, 0.0 }
  0x9d   :  { %199 = vmatpush.msk.msra.mxu1 %vm149_vm1, %v141_v30 }
  0x9f   :  { %163 = vmatpush.msra.mxu1 %v140_v32 }
  0xa1   :  { %164 = vmatpush.msra.mxu1 %v139_v35 }
  0xa3   :  { %165 = vmatpush.msra.mxu1 %v138_v38 }
  0xa5   :  { %166 = vmatpush.msra.mxu1 %v137_v41 }
  0xa7   :  { %167 = vmatpush.msra.mxu1 %v136_v42 }
  0xa9   :  { %168 = vmatpush.msra.mxu1 %v135_v43 }
  0xaa   :  { %200 = vmatmul.msk.f32.vlgmr.msra.gmra.mxu1 %vm145_vm2, %v142_v44 }
 0x127   :  { %v170_v46 = vpop.f32.mrf.mxu1 }
 0x128   :  { %v171_v47 = vadd.f32 %v170_v46, %v144_v45 }
 0x12a   :  { %174 = vst.msk [vmem:[#allocation3] sm:$0x1] %vm173_vm3, %v171_v47 }
 0x12b   :  { %185 = dma.vmem_to_hbm [thread:$0]  %s181_s25, 16, %s183_s27, [#allocation4]  }
 0x12c   :  { %232 = dma.done.wait [#allocation4], 16  }
 0x12d   :  { %233 = vsyncadd [#allocation4], 4294967280 }
 0x12e   :  { %190 = vsyncpa [#allocation4], 1 }

</bundles_post_ra>
